<compile_context>
chip_gen: v5e
topology: v5e:2x2
jax: 0.10.0
libtpu: 0.0.40
codegen_flags: <defaults>
</compile_context>

<pallas_src>
import functools

import jax
import jax.numpy as jnp
from jax.experimental import pallas as pl
from jax.experimental.pallas import tpu as pltpu

EPS = 1e-5  # PyTorch BatchNorm2d default eps


# --------------------------------------------------------------------------- #
# Kernels (all compute is (channels, M) with M on the 128-lane axis)
# --------------------------------------------------------------------------- #
def _deconv_stats_kernel(tap_ref, slab_ref, w_ref, y_ref, ps_ref, acc_ref, st_ref):
    # grid = (phase, m_tile, tap); tap is the reduction axis (innermost).
    # tap_ref (scalar prefetch, SMEM) is consumed by the index_maps only.
    del tap_ref
    m, t = pl.program_id(1), pl.program_id(2)
    mt, nt = pl.num_programs(1), pl.num_programs(2)

    @pl.when(jnp.logical_and(m == 0, t == 0))
    def _():
        st_ref[...] = jnp.zeros_like(st_ref)

    @pl.when(t == 0)
    def _():
        acc_ref[...] = jnp.zeros_like(acc_ref)

    # One tap of the sub-pixel (phase) decomposition of the transposed conv.
    acc_ref[...] += jnp.dot(w_ref[0, 0], slab_ref[0],
                            preferred_element_type=jnp.float32)     # (C, TM)

    @pl.when(t == nt - 1)
    def _():
        y = acc_ref[...]                                   # f32 accumulator
        y_ref[0] = y.astype(y_ref.dtype)                   # bf16 store (HBM saver)
        # Padded lanes are exactly zero -> contribute nothing to sum/sumsq.
        # TODO(synk): for very large N*OH*OW use a Chan/Welford merge of
        # per-tile centered partials; f32 sum/sumsq can cancel catastrophically.
        st_ref[:, 0:1] += jnp.sum(y, axis=1, keepdims=True)
        st_ref[:, 1:2] += jnp.sum(y * y, axis=1, keepdims=True)

    @pl.when(jnp.logical_and(m == mt - 1, t == nt - 1))
    def _():
        ps_ref[0] = st_ref[...]


def _bn_relu_conv_stats_kernel(y_ref, ss_ref, w2_ref, z_ref, ps_ref, st_ref,
                               *, n_valid):
    # BN1 as fused per-channel scale/shift (one FMA) + ReLU, then the 1x1 conv
    # as a matmul; accumulates BN2 partial stats in VMEM scratch across m.
    m = pl.program_id(1)
    mt = pl.num_programs(1)
    tm = y_ref.shape[-1]

    @pl.when(m == 0)
    def _():
        st_ref[...] = jnp.zeros_like(st_ref)

    scale = ss_ref[:, 0:1]                                           # (C, 1)
    shift = ss_ref[:, 1:2]
    h = jnp.maximum(y_ref[0].astype(jnp.float32) * scale + shift, 0.0)
    z = jnp.dot(w2_ref[...], h, preferred_element_type=jnp.float32)  # (outc, TM)
    z_ref[0] = z.astype(z_ref.dtype)

    # Mask padded lanes out of the BN2 stats (h = relu(shift) != 0 there).
    lane = jax.lax.broadcasted_iota(jnp.int32, (1, tm), 1) + m * tm
    zm = jnp.where(lane < n_valid, z, 0.0)
    st_ref[:, 0:1] += jnp.sum(zm, axis=1, keepdims=True)
    st_ref[:, 1:2] += jnp.sum(zm * zm, axis=1, keepdims=True)

    @pl.when(m == mt - 1)
    def _():
        ps_ref[0] = st_ref[...]


# --------------------------------------------------------------------------- #
# Host-side helpers
# --------------------------------------------------------------------------- #
def _tap_table(K, S, P):
    """Sub-pixel decomposition: taps[phase] = [(padded_start, kernel_index)]."""
    offs, taps = [], {}
    for ph in range(S):
        r = (ph + P) % S
        lst = []
        for j in range(K // S):
            k = r + S * j
            off = (ph + P - k) // S       # input index = output_subpixel_index + off
            lst.append((off, k))
            offs.append(off)
    # recompute with padding applied
        taps[ph] = lst
    pad_lo = max(0, -min(offs))
    pad_hi = max(0, max(offs))
    taps = {ph: [(off + pad_lo, k) for off, k in lst] for ph, lst in taps.items()}
    return pad_lo, pad_hi, taps


def _choose_tiling(nhw, c, outc, inter_bytes, vmem_budget_bytes=24 * 1024 * 1024):
    """Pick (tm, mt, nhw_pad): tm a multiple of 128, working set under budget."""
    # Approx per-lane VMEM bytes (double-buffered in/out blocks + f32 accum).
    bpl1 = 2 * 4 * c + 2 * inter_bytes * c + 4 * c     # slabs f32 x2, y x2, acc
    bpl2 = 2 * inter_bytes * c + 2 * inter_bytes * outc
    cap = (vmem_budget_bytes // max(bpl1, bpl2)) // 128 * 128
    cap = max(128, min(65536, cap))
    mt = (nhw + cap - 1) // cap                         # number of M tiles
    tm = ((nhw + mt - 1) // mt + 127) // 128 * 128      # minimal 128-mult tile
    return tm, mt, tm * mt


def _finalize_bn(pstat, gamma, beta, m_total):
    """Reduce per-phase (sum, sumsq) partials -> fused per-channel scale/shift."""
    s = jnp.sum(pstat, axis=0)                              # (C, 2)
    mean = s[:, 0] / m_total
    var = jnp.maximum(s[:, 1] / m_total - mean * mean, 0.0)  # biased batch var
    scale = gamma * jax.lax.rsqrt(var + EPS)
    shift = beta - mean * scale
    return jnp.stack([scale, shift], axis=1)                # (C, 2)


# --------------------------------------------------------------------------- #
# Forward pass
# --------------------------------------------------------------------------- #
@functools.partial(jax.jit, static_argnums=(2, 3, 4, 5))
def group_up_conv(x_nchw, params, kernel_size=4, stride=2, padding=1,
                  inter_dtype=jnp.bfloat16):
    """Forward of GroupUpConvLayer (training-mode BN).  x: (N, inc, H, W) f32."""
    wt, bt, g1, be1, w2, g2, be2 = params
    del bt  # cancelled by training-mode BN mean subtraction (NOT valid in eval)
    N, C, H, W = x_nchw.shape
    K, S, P = kernel_size, stride, padding
    outc = w2.shape[0]
    assert K % S == 0 and K == S + 2 * P, "sub-pixel decomposition needs K == S + 2P, S | K"
    OH, OW = S * H, S * W
    NHW = N * H * W
    nph = S * S                       # output sub-pixel phases
    nt = (K // S) ** 2                # taps per phase (no zero multiplies)

    pad_lo, pad_hi, taps = _tap_table(K, S, P)
    tm, mt, NHW_pad = _choose_tiling(NHW, C, outc, jnp.dtype(inter_dtype).itemsize)
    m_total = float(nph * NHW)        # = N * OH * OW, BN batch element count

    # ---- glue: unique shifted slabs (dedup of the nph*nt tap reads) ---------
    used = sorted({(sh, sw)
                   for ph in range(S) for pw in range(S)
                   for (sh, _) in taps[ph] for (sw, _) in taps[pw]})
    slab_id = {p: i for i, p in enumerate(used)}

    x_c = jnp.transpose(x_nchw, (1, 0, 2, 3))                        # (C, N, H, W)
    x_p = jnp.pad(x_c, ((0, 0), (0, 0), (pad_lo, pad_hi), (pad_lo, pad_hi)))
    slabs = jnp.stack([x_p[:, :, sh:sh + H, sw:sw + W].reshape(C, NHW)
                       for (sh, sw) in used], axis=0)                # (nslab, C, NHW)
    if NHW_pad > NHW:
        slabs = jnp.pad(slabs, ((0, 0), (0, 0), (0, NHW_pad - NHW)))

    # Per-(phase, tap) weights and the (phase, tap) -> slab index table.
    w_blocks, tap_ids = [], []
    for ph in range(S):
        for pw in range(S):
            wrow, trow = [], []
            for (sh, kh) in taps[ph]:
                for (sw, kw) in taps[pw]:
                    wrow.append(jnp.transpose(wt[:, :, kh, kw], (1, 0)))  # (co, ci)
                    trow.append(slab_id[(sh, sw)])
            w_blocks.append(jnp.stack(wrow, axis=0))
            tap_ids.append(trow)
    w1f = jnp.stack(w_blocks, axis=0)                                 # (nph, nt, C, C)
    tap_tbl = jnp.asarray(tap_ids, dtype=jnp.int32)                   # (nph, nt)
    w2m = w2[:, :, 0, 0]                                              # (outc, C)

    cparams3 = pltpu.CompilerParams(
        dimension_semantics=("parallel", "arbitrary", "arbitrary"),
        vmem_limit_bytes=32 * 1024 * 1024)
    cparams2 = pltpu.CompilerParams(
        dimension_semantics=("parallel", "arbitrary"),
        vmem_limit_bytes=32 * 1024 * 1024)

    # ---- call 1: per-phase deconv (tap-reduced matmuls) + BN1 stats ---------
    # NOTE: if the slab DMA is still exposed at large tm, the slabs in_spec can
    # take pipeline_mode=pl.Buffered(3) for one extra (C, tm) f32 buffer.
    y_ph, pstat1 = pl.pallas_call(
        _deconv_stats_kernel,
        grid_spec=pltpu.PrefetchScalarGridSpec(
            num_scalar_prefetch=1,
            grid=(nph, mt, nt),
            in_specs=[
                # tap-selected slab: data-dependent block index via prefetch
                pl.BlockSpec((1, C, tm), lambda p, m, t, tap: (tap[p, t], 0, m)),
                pl.BlockSpec((1, 1, C, C), lambda p, m, t, tap: (p, t, 0, 0)),
            ],
            out_specs=[
                pl.BlockSpec((1, C, tm), lambda p, m, t, tap: (p, 0, m)),
                pl.BlockSpec((1, C, 2), lambda p, m, t, tap: (p, 0, 0)),
            ],
            scratch_shapes=[pltpu.VMEM((C, tm), jnp.float32),
                            pltpu.VMEM((C, 2), jnp.float32)]),
        out_shape=(
            jax.ShapeDtypeStruct((nph, C, NHW_pad), inter_dtype),
            jax.ShapeDtypeStruct((nph, C, 2), jnp.float32),
        ),
        compiler_params=cparams3,
    )(tap_tbl, slabs, w1f)

    ss1 = _finalize_bn(pstat1, g1, be1, m_total)                      # (C, 2)

    # ---- call 2: BN1 (fused scale/shift) + ReLU + 1x1 conv + BN2 stats ------
    z_ph, pstat2 = pl.pallas_call(
        functools.partial(_bn_relu_conv_stats_kernel, n_valid=NHW),
        grid=(nph, mt),
        in_specs=[
            pl.BlockSpec((1, C, tm), lambda p, m: (p, 0, m)),
            pl.BlockSpec((C, 2), lambda p, m: (0, 0)),
            pl.BlockSpec((outc, C), lambda p, m: (0, 0)),
        ],
        out_specs=[
            pl.BlockSpec((1, outc, tm), lambda p, m: (p, 0, m)),
            pl.BlockSpec((1, outc, 2), lambda p, m: (p, 0, 0)),
        ],
        scratch_shapes=[pltpu.VMEM((outc, 2), jnp.float32)],
        out_shape=(
            jax.ShapeDtypeStruct((nph, outc, NHW_pad), inter_dtype),
            jax.ShapeDtypeStruct((nph, outc, 2), jnp.float32),
        ),
        compiler_params=cparams2,
    )(y_ph, ss1, w2m)

    ss2 = _finalize_bn(pstat2, g2, be2, m_total)                      # (outc, 2)

    # ---- glue: BN2 + ReLU fused by XLA into the sub-pixel phase interleave --
    z = z_ph[:, :, :NHW].astype(jnp.float32)
    z = jnp.maximum(z * ss2[:, 0][None, :, None] + ss2[:, 1][None, :, None], 0.0)
    o = z.reshape(S, S, outc, N, H, W)
    o = jnp.transpose(o, (3, 2, 4, 0, 5, 1))          # (N, outc, H, ph, W, pw)
    return o.reshape(N, outc, OH, OW)


# --------------------------------------------------------------------------- #
# Pure-JAX (XLA) reference mirroring PyTorch training-mode forward
# --------------------------------------------------------------------------- #
def ref_forward(x, params, kernel_size=4, stride=2, padding=1):
    wt, bt, g1, be1, w2, g2, be2 = params
    K, S, P = kernel_size, stride, padding
    wflip = jnp.transpose(jnp.flip(wt, axis=(2, 3)), (1, 0, 2, 3))  # OIHW
    y = jax.lax.conv_general_dilated(
        x, wflip, window_strides=(1, 1),
        padding=((K - 1 - P, K - 1 - P), (K - 1 - P, K - 1 - P)),
        lhs_dilation=(S, S),
        dimension_numbers=('NCHW', 'OIHW', 'NCHW'))
    y = y + bt.reshape(1, -1, 1, 1)

    def bn_relu(t, g, b):
        mu = jnp.mean(t, axis=(0, 2, 3), keepdims=True)
        var = jnp.mean((t - mu) ** 2, axis=(0, 2, 3), keepdims=True)
        t = (t - mu) * jax.lax.rsqrt(var + EPS) * g.reshape(1, -1, 1, 1) \
            + b.reshape(1, -1, 1, 1)
        return jnp.maximum(t, 0.0)

    y = bn_relu(y, g1, be1)
    z = jax.lax.conv_general_dilated(
        y, w2, window_strides=(1, 1), padding='VALID',
        dimension_numbers=('NCHW', 'OIHW', 'NCHW'))
    return bn_relu(z, g2, be2)


if __name__ == "__main__":
    inc, outc = 4, 8
    N, H, W = 2, 16, 16
    key = jax.random.PRNGKey(0)
    k = jax.random.split(key, 8)

    x = jax.random.normal(k[0], (N, inc, H, W), jnp.float32)
    wt = jax.random.normal(k[1], (inc, inc, 4, 4), jnp.float32) * 0.1   # ConvTranspose2d weight
    bt = jax.random.normal(k[2], (inc,), jnp.float32) * 0.1             # ConvTranspose2d bias
    g1 = 1.0 + 0.1 * jax.random.normal(k[3], (inc,), jnp.float32)       # BN1 gamma
    be1 = 0.1 * jax.random.normal(k[4], (inc,), jnp.float32)            # BN1 beta
    w2 = jax.random.normal(k[5], (outc, inc, 1, 1), jnp.float32) * 0.1  # 1x1 conv weight
    g2 = 1.0 + 0.1 * jax.random.normal(k[6], (outc,), jnp.float32)      # BN2 gamma
    be2 = 0.1 * jax.random.normal(k[7], (outc,), jnp.float32)           # BN2 beta
    params = (wt, bt, g1, be1, w2, g2, be2)

    ref = jax.block_until_ready(ref_forward(x, params))

    # f32 intermediates: validates the kernel math tightly against XLA.
    out_f32 = jax.block_until_ready(
        group_up_conv(x, params, 4, 2, 1, jnp.float32))
    assert out_f32.shape == (N, outc, 2 * H, 2 * W), out_f32.shape
    assert jnp.allclose(out_f32, ref, rtol=1e-4, atol=1e-4), \
        float(jnp.max(jnp.abs(out_f32 - ref)))

    # bf16 intermediates (production config: halves HBM traffic of y / z).
    out_bf16 = jax.block_until_ready(group_up_conv(x, params))
    assert out_bf16.shape == (N, outc, 2 * H, 2 * W), out_bf16.shape
    assert jnp.allclose(out_bf16, ref, rtol=3e-2, atol=3e-2), \
        float(jnp.max(jnp.abs(out_bf16 - ref)))

    print("KERNEL_OK")
</pallas_src>

<mosaic_0001>
module attributes {stable_mosaic.version = 11 : i64} {
  func.func @_deconv_stats_kernel(%arg0: i32, %arg1: i32, %arg2: i32, %arg3: memref<4x4xi32, #tpu.memory_space<smem>>, %arg4: memref<1x4x512xf32, #tpu.memory_space<vmem>>, %arg5: memref<1x1x4x4xf32, #tpu.memory_space<vmem>>, %arg6: memref<1x4x512xf32, #tpu.memory_space<vmem>>, %arg7: memref<1x4x2xf32, #tpu.memory_space<vmem>>, %arg8: memref<4x512xf32, #tpu.memory_space<vmem>>, %arg9: memref<4x2xf32, #tpu.memory_space<vmem>>) attributes {dimension_semantics = [#tpu.dimension_semantics<parallel>, #tpu.dimension_semantics<arbitrary>, #tpu.dimension_semantics<arbitrary>], iteration_bounds = array<i64: 4, 1, 4>, scalar_prefetch = 1 : i64, scratch_operands = 2 : i64, tpu.core_type = #tpu.core_type<tc>, window_params = [{transform_indices = @transform_0, window_bounds = array<i64: 1, 4, 512>}, {transform_indices = @transform_1, window_bounds = array<i64: 1, 1, 4, 4>}, {transform_indices = @transform_2, window_bounds = array<i64: 1, 4, 512>}, {transform_indices = @transform_3, window_bounds = array<i64: 1, 4, 2>}]} {
    %c0_i32 = arith.constant 0 : i32
    %0 = arith.cmpi eq, %arg1, %c0_i32 : i32
    %c0_i32_0 = arith.constant 0 : i32
    %1 = arith.cmpi eq, %arg2, %c0_i32_0 : i32
    %2 = arith.andi %0, %1 : i1
    %3 = arith.extui %2 : i1 to i32
    %c0_i32_1 = arith.constant 0 : i32
    %4 = arith.cmpi ne, %3, %c0_i32_1 : i32
    scf.if %4 {
      %cst_18 = arith.constant 0.000000e+00 : f32
      %24 = vector.broadcast %cst_18 : f32 to vector<4x2xf32>
      %c0_19 = arith.constant 0 : index
      %c0_20 = arith.constant 0 : index
      %25 = vector.load %arg9[%c0_19, %c0_20] : memref<4x2xf32, #tpu.memory_space<vmem>>, vector<4x2xf32>
      tpu.vector_store %arg9[%c0_19, %c0_20], %24 {strides = array<i32>} : memref<4x2xf32, #tpu.memory_space<vmem>>, vector<4x2xf32>,
    } else {
    }
    %c0_i32_2 = arith.constant 0 : i32
    %5 = arith.cmpi eq, %arg2, %c0_i32_2 : i32
    %6 = arith.extui %5 : i1 to i32
    %c0_i32_3 = arith.constant 0 : i32
    %7 = arith.cmpi ne, %6, %c0_i32_3 : i32
    scf.if %7 {
      %cst_18 = arith.constant 0.000000e+00 : f32
      %24 = vector.broadcast %cst_18 : f32 to vector<4x512xf32>
      %c0_19 = arith.constant 0 : index
      %c0_20 = arith.constant 0 : index
      %25 = vector.load %arg8[%c0_19, %c0_20] : memref<4x512xf32, #tpu.memory_space<vmem>>, vector<4x512xf32>
      tpu.vector_store %arg8[%c0_19, %c0_20], %24 {strides = array<i32>} : memref<4x512xf32, #tpu.memory_space<vmem>>, vector<4x512xf32>,
    } else {
    }
    %c0 = arith.constant 0 : index
    %c0_4 = arith.constant 0 : index
    %8 = vector.load %arg8[%c0, %c0_4] : memref<4x512xf32, #tpu.memory_space<vmem>>, vector<4x512xf32>
    %c0_5 = arith.constant 0 : index
    %c0_6 = arith.constant 0 : index
    %c0_7 = arith.constant 0 : index
    %c0_8 = arith.constant 0 : index
    %9 = vector.load %arg5[%c0_5, %c0_6, %c0_7, %c0_8] : memref<1x1x4x4xf32, #tpu.memory_space<vmem>>, vector<1x1x4x4xf32>
    %10 = vector.shape_cast %9 : vector<1x1x4x4xf32> to vector<4x4xf32>
    %c0_9 = arith.constant 0 : index
    %c0_10 = arith.constant 0 : index
    %c0_11 = arith.constant 0 : index
    %11 = vector.load %arg4[%c0_9, %c0_10, %c0_11] : memref<1x4x512xf32, #tpu.memory_space<vmem>>, vector<1x4x512xf32>
    %12 = vector.shape_cast %11 : vector<1x4x512xf32> to vector<4x512xf32>
    %cst = arith.constant dense<0.000000e+00> : vector<4x512xf32>
    %13 = tpu.matmul %10, %12, %cst {dimension_numbers = #tpu.dot_dimension_numbers<[1], [0], [0], [1], [0, 0, 1, 1], [], []>} : vector<4x4xf32>, vector<4x512xf32>, vector<4x512xf32> -> vector<4x512xf32>
    %14 = arith.addf %8, %13 : vector<4x512xf32>
    %c0_12 = arith.constant 0 : index
    %c0_13 = arith.constant 0 : index
    %15 = vector.load %arg8[%c0_12, %c0_13] : memref<4x512xf32, #tpu.memory_space<vmem>>, vector<4x512xf32>
    tpu.vector_store %arg8[%c0_12, %c0_13], %14 {strides = array<i32>} : memref<4x512xf32, #tpu.memory_space<vmem>>, vector<4x512xf32>,
    %c3_i32 = arith.constant 3 : i32
    %16 = arith.cmpi eq, %arg2, %c3_i32 : i32
    %17 = arith.extui %16 : i1 to i32
    %c0_i32_14 = arith.constant 0 : i32
    %18 = arith.cmpi ne, %17, %c0_i32_14 : i32
    scf.if %18 {
      %c0_18 = arith.constant 0 : index
      %c0_19 = arith.constant 0 : index
      %24 = vector.load %arg8[%c0_18, %c0_19] : memref<4x512xf32, #tpu.memory_space<vmem>>, vector<4x512xf32>
      %c0_20 = arith.constant 0 : index
      %c0_21 = arith.constant 0 : index
      %c0_22 = arith.constant 0 : index
      %25 = vector.load %arg6[%c0_20, %c0_21, %c0_22] : memref<1x4x512xf32, #tpu.memory_space<vmem>>, vector<1x4x512xf32>
      %26 = vector.shape_cast %25 : vector<1x4x512xf32> to vector<4x512xf32>
      %27 = vector.shape_cast %24 : vector<4x512xf32> to vector<1x4x512xf32>
      tpu.vector_store %arg6[%c0_20, %c0_21, %c0_22], %27 {strides = array<i32>} : memref<1x4x512xf32, #tpu.memory_space<vmem>>, vector<1x4x512xf32>,
      %c0_23 = arith.constant 0 : index
      %c0_24 = arith.constant 0 : index
      %28 = vector.load %arg9[%c0_23, %c0_24] : memref<4x2xf32, #tpu.memory_space<vmem>>, vector<4x1xf32>
      %cst_25 = arith.constant dense<0.000000e+00> : vector<4xf32>
      %29 = vector.multi_reduction <add>, %24, %cst_25 [1] : vector<4x512xf32> to vector<4xf32>
      %30 = vector.shape_cast %29 : vector<4xf32> to vector<4x1xf32>
      %31 = arith.addf %28, %30 : vector<4x1xf32>
      %c0_26 = arith.constant 0 : index
      %c0_27 = arith.constant 0 : index
      %32 = vector.load %arg9[%c0_26, %c0_27] : memref<4x2xf32, #tpu.memory_space<vmem>>, vector<4x1xf32>
      tpu.vector_store %arg9[%c0_26, %c0_27], %31 {strides = array<i32>} : memref<4x2xf32, #tpu.memory_space<vmem>>, vector<4x1xf32>,
      %c0_28 = arith.constant 0 : index
      %c1 = arith.constant 1 : index
      %33 = vector.load %arg9[%c0_28, %c1] : memref<4x2xf32, #tpu.memory_space<vmem>>, vector<4x1xf32>
      %34 = arith.mulf %24, %24 : vector<4x512xf32>
      %cst_29 = arith.constant dense<0.000000e+00> : vector<4xf32>
      %35 = vector.multi_reduction <add>, %34, %cst_29 [1] : vector<4x512xf32> to vector<4xf32>
      %36 = vector.shape_cast %35 : vector<4xf32> to vector<4x1xf32>
      %37 = arith.addf %33, %36 : vector<4x1xf32>
      %c0_30 = arith.constant 0 : index
      %c1_31 = arith.constant 1 : index
      %38 = vector.load %arg9[%c0_30, %c1_31] : memref<4x2xf32, #tpu.memory_space<vmem>>, vector<4x1xf32>
      tpu.vector_store %arg9[%c0_30, %c1_31], %37 {strides = array<i32>} : memref<4x2xf32, #tpu.memory_space<vmem>>, vector<4x1xf32>,
    } else {
    }
    %c0_i32_15 = arith.constant 0 : i32
    %19 = arith.cmpi eq, %arg1, %c0_i32_15 : i32
    %c3_i32_16 = arith.constant 3 : i32
    %20 = arith.cmpi eq, %arg2, %c3_i32_16 : i32
    %21 = arith.andi %19, %20 : i1
    %22 = arith.extui %21 : i1 to i32
    %c0_i32_17 = arith.constant 0 : i32
    %23 = arith.cmpi ne, %22, %c0_i32_17 : i32
    scf.if %23 {
      %c0_18 = arith.constant 0 : index
      %c0_19 = arith.constant 0 : index
      %24 = vector.load %arg9[%c0_18, %c0_19] : memref<4x2xf32, #tpu.memory_space<vmem>>, vector<4x2xf32>
      %c0_20 = arith.constant 0 : index
      %c0_21 = arith.constant 0 : index
      %c0_22 = arith.constant 0 : index
      %25 = vector.load %arg7[%c0_20, %c0_21, %c0_22] : memref<1x4x2xf32, #tpu.memory_space<vmem>>, vector<1x4x2xf32>
      %26 = vector.shape_cast %25 : vector<1x4x2xf32> to vector<4x2xf32>
      %27 = vector.shape_cast %24 : vector<4x2xf32> to vector<1x4x2xf32>
      tpu.vector_store %arg7[%c0_20, %c0_21, %c0_22], %27 {strides = array<i32>} : memref<1x4x2xf32, #tpu.memory_space<vmem>>, vector<1x4x2xf32>,
    } else {
    }
    return
  }
  func.func @transform_0(%arg0: i32, %arg1: i32, %arg2: i32, %arg3: memref<4x4xi32, #tpu.memory_space<smem>>) -> (i32, i32, i32) {
    %0 = arith.index_cast %arg0 : i32 to index
    %1 = arith.index_cast %arg2 : i32 to index
    %2 = memref.load %arg3[%0, %1] : memref<4x4xi32, #tpu.memory_space<smem>>
    %c0_i32 = arith.constant 0 : i32
    %c0_i32_0 = arith.constant 0 : i32
    return %2, %c0_i32, %arg1 : i32, i32, i32
  }
  func.func @transform_1(%arg0: i32, %arg1: i32, %arg2: i32, %arg3: memref<4x4xi32, #tpu.memory_space<smem>>) -> (i32, i32, i32, i32) {
    %c0_i32 = arith.constant 0 : i32
    %c0_i32_0 = arith.constant 0 : i32
    %c0_i32_1 = arith.constant 0 : i32
    return %arg0, %arg2, %c0_i32, %c0_i32_0 : i32, i32, i32, i32
  }
  func.func @transform_2(%arg0: i32, %arg1: i32, %arg2: i32, %arg3: memref<4x4xi32, #tpu.memory_space<smem>>) -> (i32, i32, i32) {
    %c0_i32 = arith.constant 0 : i32
    %c0_i32_0 = arith.constant 0 : i32
    return %arg0, %c0_i32, %arg1 : i32, i32, i32
  }
  func.func @transform_3(%arg0: i32, %arg1: i32, %arg2: i32, %arg3: memref<4x4xi32, #tpu.memory_space<smem>>) -> (i32, i32, i32) {
    %c0_i32 = arith.constant 0 : i32
    %c0_i32_0 = arith.constant 0 : i32
    %c0_i32_1 = arith.constant 0 : i32
    return %arg0, %c0_i32, %c0_i32_0 : i32, i32, i32
  }
}

module attributes {stable_mosaic.version = 11 : i64} {
  func.func @_bn_relu_conv_stats_kernel(%arg0: i32, %arg1: i32, %arg2: memref<1x4x512xf32, #tpu.memory_space<vmem>>, %arg3: memref<4x2xf32, #tpu.memory_space<vmem>>, %arg4: memref<8x4xf32, #tpu.memory_space<vmem>>, %arg5: memref<1x8x512xf32, #tpu.memory_space<vmem>>, %arg6: memref<1x8x2xf32, #tpu.memory_space<vmem>>, %arg7: memref<8x2xf32, #tpu.memory_space<vmem>>) attributes {dimension_semantics = [#tpu.dimension_semantics<parallel>, #tpu.dimension_semantics<arbitrary>], iteration_bounds = array<i64: 4, 1>, scalar_prefetch = 0 : i64, scratch_operands = 1 : i64, tpu.core_type = #tpu.core_type<tc>, window_params = [{transform_indices = @transform_0, window_bounds = array<i64: 1, 4, 512>}, {pipeline_mode = #tpu.pipeline_mode<synchronous>, transform_indices = @transform_1, window_bounds = array<i64: 4, 2>}, {pipeline_mode = #tpu.pipeline_mode<synchronous>, transform_indices = @transform_2, window_bounds = array<i64: 8, 4>}, {transform_indices = @transform_3, window_bounds = array<i64: 1, 8, 512>}, {transform_indices = @transform_4, window_bounds = array<i64: 1, 8, 2>}]} {
    %c0_i32 = arith.constant 0 : i32
    %0 = arith.cmpi eq, %arg1, %c0_i32 : i32
    %1 = arith.extui %0 : i1 to i32
    %c0_i32_0 = arith.constant 0 : i32
    %2 = arith.cmpi ne, %1, %c0_i32_0 : i32
    scf.if %2 {
      %cst_26 = arith.constant 0.000000e+00 : f32
      %42 = vector.broadcast %cst_26 : f32 to vector<8x2xf32>
      %c0_27 = arith.constant 0 : index
      %c0_28 = arith.constant 0 : index
      %43 = vector.load %arg7[%c0_27, %c0_28] : memref<8x2xf32, #tpu.memory_space<vmem>>, vector<8x2xf32>
      tpu.vector_store %arg7[%c0_27, %c0_28], %42 {strides = array<i32>} : memref<8x2xf32, #tpu.memory_space<vmem>>, vector<8x2xf32>,
    } else {
    }
    %c0 = arith.constant 0 : index
    %c0_1 = arith.constant 0 : index
    %3 = vector.load %arg3[%c0, %c0_1] : memref<4x2xf32, #tpu.memory_space<vmem>>, vector<4x1xf32>
    %c0_2 = arith.constant 0 : index
    %c1 = arith.constant 1 : index
    %4 = vector.load %arg3[%c0_2, %c1] : memref<4x2xf32, #tpu.memory_space<vmem>>, vector<4x1xf32>
    %c0_3 = arith.constant 0 : index
    %c0_4 = arith.constant 0 : index
    %c0_5 = arith.constant 0 : index
    %5 = vector.load %arg2[%c0_3, %c0_4, %c0_5] : memref<1x4x512xf32, #tpu.memory_space<vmem>>, vector<1x4x512xf32>
    %6 = vector.shape_cast %5 : vector<1x4x512xf32> to vector<4x512xf32>
    %7 = vector.broadcast %3 : vector<4x1xf32> to vector<4x512xf32>
    %8 = arith.mulf %6, %7 : vector<4x512xf32>
    %9 = vector.broadcast %4 : vector<4x1xf32> to vector<4x512xf32>
    %10 = arith.addf %8, %9 : vector<4x512xf32>
    %cst = arith.constant 0.000000e+00 : f32
    %11 = vector.broadcast %cst : f32 to vector<4x512xf32>
    %12 = arith.maximumf %10, %11 : vector<4x512xf32>
    %c0_6 = arith.constant 0 : index
    %c0_7 = arith.constant 0 : index
    %13 = vector.load %arg4[%c0_6, %c0_7] : memref<8x4xf32, #tpu.memory_space<vmem>>, vector<8x4xf32>
    %cst_8 = arith.constant dense<0.000000e+00> : vector<8x512xf32>
    %14 = tpu.matmul %13, %12, %cst_8 {dimension_numbers = #tpu.dot_dimension_numbers<[1], [0], [0], [1], [0, 0, 1, 1], [], []>} : vector<8x4xf32>, vector<4x512xf32>, vector<8x512xf32> -> vector<8x512xf32>
    %c0_9 = arith.constant 0 : index
    %c0_10 = arith.constant 0 : index
    %c0_11 = arith.constant 0 : index
    %15 = vector.load %arg5[%c0_9, %c0_10, %c0_11] : memref<1x8x512xf32, #tpu.memory_space<vmem>>, vector<1x8x512xf32>
    %16 = vector.shape_cast %15 : vector<1x8x512xf32> to vector<8x512xf32>
    %17 = vector.shape_cast %14 : vector<8x512xf32> to vector<1x8x512xf32>
    tpu.vector_store %arg5[%c0_9, %c0_10, %c0_11], %17 {strides = array<i32>} : memref<1x8x512xf32, #tpu.memory_space<vmem>>, vector<1x8x512xf32>,
    %18 = tpu.iota {dimensions = array<i32: 1>} : vector<1x512xi32>
    %c512_i32 = arith.constant 512 : i32
    %19 = arith.muli %arg1, %c512_i32 : i32
    %20 = vector.broadcast %19 : i32 to vector<1x512xi32>
    %21 = arith.addi %18, %20 : vector<1x512xi32>
    %c512_i32_12 = arith.constant 512 : i32
    %22 = vector.broadcast %c512_i32_12 : i32 to vector<1x512xi32>
    %23 = arith.cmpi slt, %21, %22 : vector<1x512xi32>
    %cst_13 = arith.constant 0.000000e+00 : f32
    %24 = vector.shape_cast %23 : vector<1x512xi1> to vector<1x512xi1>
    %25 = vector.broadcast %24 : vector<1x512xi1> to vector<8x512xi1>
    %26 = vector.broadcast %cst_13 : f32 to vector<8x512xf32>
    %27 = arith.select %25, %14, %26 : vector<8x512xi1>, vector<8x512xf32>
    %c0_14 = arith.constant 0 : index
    %c0_15 = arith.constant 0 : index
    %28 = vector.load %arg7[%c0_14, %c0_15] : memref<8x2xf32, #tpu.memory_space<vmem>>, vector<8x1xf32>
    %cst_16 = arith.constant dense<0.000000e+00> : vector<8xf32>
    %29 = vector.multi_reduction <add>, %27, %cst_16 [1] : vector<8x512xf32> to vector<8xf32>
    %30 = vector.shape_cast %29 : vector<8xf32> to vector<8x1xf32>
    %31 = arith.addf %28, %30 : vector<8x1xf32>
    %c0_17 = arith.constant 0 : index
    %c0_18 = arith.constant 0 : index
    %32 = vector.load %arg7[%c0_17, %c0_18] : memref<8x2xf32, #tpu.memory_space<vmem>>, vector<8x1xf32>
    tpu.vector_store %arg7[%c0_17, %c0_18], %31 {strides = array<i32>} : memref<8x2xf32, #tpu.memory_space<vmem>>, vector<8x1xf32>,
    %c0_19 = arith.constant 0 : index
    %c1_20 = arith.constant 1 : index
    %33 = vector.load %arg7[%c0_19, %c1_20] : memref<8x2xf32, #tpu.memory_space<vmem>>, vector<8x1xf32>
    %34 = arith.mulf %27, %27 : vector<8x512xf32>
    %cst_21 = arith.constant dense<0.000000e+00> : vector<8xf32>
    %35 = vector.multi_reduction <add>, %34, %cst_21 [1] : vector<8x512xf32> to vector<8xf32>
    %36 = vector.shape_cast %35 : vector<8xf32> to vector<8x1xf32>
    %37 = arith.addf %33, %36 : vector<8x1xf32>
    %c0_22 = arith.constant 0 : index
    %c1_23 = arith.constant 1 : index
    %38 = vector.load %arg7[%c0_22, %c1_23] : memref<8x2xf32, #tpu.memory_space<vmem>>, vector<8x1xf32>
    tpu.vector_store %arg7[%c0_22, %c1_23], %37 {strides = array<i32>} : memref<8x2xf32, #tpu.memory_space<vmem>>, vector<8x1xf32>,
    %c0_i32_24 = arith.constant 0 : i32
    %39 = arith.cmpi eq, %arg1, %c0_i32_24 : i32
    %40 = arith.extui %39 : i1 to i32
    %c0_i32_25 = arith.constant 0 : i32
    %41 = arith.cmpi ne, %40, %c0_i32_25 : i32
    scf.if %41 {
      %c0_26 = arith.constant 0 : index
      %c0_27 = arith.constant 0 : index
      %42 = vector.load %arg7[%c0_26, %c0_27] : memref<8x2xf32, #tpu.memory_space<vmem>>, vector<8x2xf32>
      %c0_28 = arith.constant 0 : index
      %c0_29 = arith.constant 0 : index
      %c0_30 = arith.constant 0 : index
      %43 = vector.load %arg6[%c0_28, %c0_29, %c0_30] : memref<1x8x2xf32, #tpu.memory_space<vmem>>, vector<1x8x2xf32>
      %44 = vector.shape_cast %43 : vector<1x8x2xf32> to vector<8x2xf32>
      %45 = vector.shape_cast %42 : vector<8x2xf32> to vector<1x8x2xf32>
      tpu.vector_store %arg6[%c0_28, %c0_29, %c0_30], %45 {strides = array<i32>} : memref<1x8x2xf32, #tpu.memory_space<vmem>>, vector<1x8x2xf32>,
    } else {
    }
    return
  }
  func.func @transform_0(%arg0: i32, %arg1: i32) -> (i32, i32, i32) {
    %c0_i32 = arith.constant 0 : i32
    %c0_i32_0 = arith.constant 0 : i32
    return %arg0, %c0_i32, %arg1 : i32, i32, i32
  }
  func.func @transform_1(%arg0: i32, %arg1: i32) -> (i32, i32) {
    %c0_i32 = arith.constant 0 : i32
    %c0_i32_0 = arith.constant 0 : i32
    %c0_i32_1 = arith.constant 0 : i32
    return %c0_i32, %c0_i32_0 : i32, i32
  }
  func.func @transform_2(%arg0: i32, %arg1: i32) -> (i32, i32) {
    %c0_i32 = arith.constant 0 : i32
    %c0_i32_0 = arith.constant 0 : i32
    %c0_i32_1 = arith.constant 0 : i32
    return %c0_i32, %c0_i32_0 : i32, i32
  }
  func.func @transform_3(%arg0: i32, %arg1: i32) -> (i32, i32, i32) {
    %c0_i32 = arith.constant 0 : i32
    %c0_i32_0 = arith.constant 0 : i32
    return %arg0, %c0_i32, %arg1 : i32, i32, i32
  }
  func.func @transform_4(%arg0: i32, %arg1: i32) -> (i32, i32, i32) {
    %c0_i32 = arith.constant 0 : i32
    %c0_i32_0 = arith.constant 0 : i32
    %c0_i32_1 = arith.constant 0 : i32
    return %arg0, %c0_i32, %c0_i32_0 : i32, i32, i32
  }
}

</mosaic_0001>

<bundles_post_ra>
// kernel: group_up_conv.3
= control target key start
LH: loop header
LB: loop body
LE: loop exit
PB: predicated region body
PF: predicated region fallthrough
CT: control target
= control target key end

     0   :  { %s665_s15 = smov 0   ;;  %s667_s16 = smov 0   ;;  %s714_s0 = inlined_call_operand.vmem [shape: f32[4,4,512], index: 0, kind: input, shape index: {}]   ;;  %s715_s1 = inlined_call_operand.vmem [shape: f32[4,2], index: 1, kind: input, shape index: {}]   ;;  %s716_s2 = inlined_call_operand.vmem [shape: f32[8,4], index: 2, kind: input, shape index: {}]   ;;  %s717_s3 = inlined_call_operand.vmem [shape: f32[4,8,512], index: 3, kind: output, shape index: {0}]   ;;  %s718_s4 = inlined_call_operand.vmem [shape: f32[4,8,2], index: 4, kind: output, shape index: {1}]  }
   0x1   :  { %s669_s17 = smov 0  }
   0x2 LB: > { %s27_s18 = sadd.s32 1, %s630_s16  ;;  %p564_p0 = scmp.ge.s32.totalorder %s634_s17, 1  ;;  %s634_s17 = sphi %s669_s17, %s15_s17   ;;  %s630_s16 = sphi %s667_s16, %s720_s16   ;;  %s626_s15 = sphi %s665_s15, %s719_s15  }
   0x3   : > { %p29_p1 = scmp.ge.s32.totalorder %s27_s18, 4  ;;  %p186_p2 = scmp.lt.s32.totalorder %s634_s17, 5 }
   0x5   : > { %s722_s18 = smov (%p29_p1, %s27_s18), 0  ;;  %p187_p3 = pnand %p564_p0, %p186_p2 }
   0x6   : > { %p225_p4 = scmp.lt.s32.totalorder (!%p187_p3), %s626_s15, 3 }
   0x7   : > { %190 = sbr.rel (%p187_p3) target bundleno = 427 (0x1ab), region = 32 }
   0xc   : > { %v254_v0 = vld [vmem:[%s715_s1] sm:$0xf]  ;;  %v636_v1 = vmov 0   ;;  %v637_v2 = vmov 1   ;;  %s724_s15 = smov (!%p225_p4, %s626_s15), 3  ;;  %vm294_vm0 = vcmask 1043456  }
   0xd   : > { %610 = vset.pattern.permute.xlu0 %v636_v1  ;;  %v638_v3 = vmov 839922192   ;;  %s580_s21 = sshll.u32 %s724_s15, 4  ;;  %v280_v18 = vld [vmem:[%s716_s2] sm:$0xff]  ;;  %vm290_vm1 = vcmask 31744   ;;  %vm252_vm2 = vcmask 15360  }
   0xe   : > { %259 = vperm.xlu0 %610, %v254_v0   ;;  %v262_v4 = vunpack.c.l.s4 %v638_v3  ;;  %s232_s24 = scalar_lea.vmem %s714_s0, %s580_s21  ;;  %v639_v23 = vmov 0.0   ;;  %s581_s27 = sshll.u32 %s724_s15, 5  ;;  %vm421_vm3 = vcmask 7168   ;;  %vm434_vm4 = vcmask 15368  }
   0xf   : > { %v255_v8 = vld [vmem:[%s232_s24] sm:$0xff]  ;;  %v256_v9 = vld [vmem:[%s232_s24 + $0x8] sm:$0xff]  ;;  %253 = vst.msk [vmem:[#allocation2] sm:$0xff] %vm252_vm2, %v639_v23  ;;  %s242_s30 = scalar_lea.vmem %s717_s3, %s581_s27  ;;  %s569_s5 = sshll.u32 %s724_s15, 3 }
  0x10   : > { %v263_v6 = vunpack.c.0.s8 %v262_v4  ;;  %s247_s8 = scalar_lea.vmem %s718_s4, %s569_s5 }
  0x16   : > { %611 = vset.pattern.permute.xlu0 %v637_v2  ;;  %v414_v38 = vld [vmem:[#allocation2] sm:$0xff] }
  0x17   : > { %269 = vperm.xlu0 %611, %v254_v0  }
  0x80   : > { %v260_v5 = vpop.permute.xlu0 %259 }
  0x81   : > { %v264_v7 = vperm.slane %v260_v5, %v263_v6 }
  0x83   : > { %v266_v11 = vmul.f32 %v264_v7, %v255_v8  ;;  %v267_v12 = vmul.f32 %v264_v7, %v256_v9 }
  0x89   : > { %v270_v10 = vpop.permute.xlu0 %269 }
  0x8a   : > { %v274_v13 = vperm.slane %v270_v10, %v263_v6 }
  0x8c   : > { %v276_v14 = vadd.f32 %v274_v13, %v266_v11  ;;  %v277_v15 = vadd.f32 %v274_v13, %v267_v12 }
  0x8e   : > { %v278_v16 = vmax.f32 %v276_v14, 0.0  ;;  %v279_v17 = vmax.f32 %v277_v15, 0.0 }
  0x90   : > { %283 = vst [vmem:[#allocation1] ss:$2 sm:$0xff] %v278_v16 }
  0x91   : > { %285 = vst [vmem:[#allocation1 + $0x10] ss:$2 sm:$0xff] %v279_v17 }
  0x97   : > { %v286_v19 = vld.sshfl [vmem:[#allocation1] sm:$0xff pattern:$0x75316420]  ;;  %v287_v20 = vld.sshfl [vmem:[#allocation1 + $0x8] sm:$0xff pattern:$0x75316420] }
  0x98   : > { %570 = vmatpush.msk.msra.mxu0 %vm294_vm0, %v286_v19  ;;  %572 = vmatpush.msk.msra.mxu1 %vm294_vm0, %v287_v20  ;;  %v288_v21 = vld.sshfl [vmem:[#allocation1 + $0x10] sm:$0xff pattern:$0x75316420]  ;;  %v289_v22 = vld.sshfl [vmem:[#allocation1 + $0x18] sm:$0xff pattern:$0x75316420] }
  0x99   : > { %574 = vmatpush.msk.msra.mxu2 %vm294_vm0, %v288_v21  ;;  %576 = vmatpush.msk.msra.mxu3 %vm294_vm0, %v289_v22 }
  0x9a   : > { %575 = vmatmul.msk.f32.vlgmr.msra.gmra.mxu2 %vm290_vm1, %v280_v18  ;;  %577 = vmatmul.msk.f32.vlgmr.msra.gmra.mxu3 %vm290_vm1, %v280_v18 }
  0x9b   : > { %571 = vmatmul.msk.f32.vlgmr.msra.gmra.mxu0 %vm290_vm1, %v280_v18  ;;  %573 = vmatmul.msk.f32.vlgmr.msra.gmra.mxu1 %vm290_vm1, %v280_v18 }
 0x118   : > { %v320_v24 = vpop.f32.mrf.mxu0  ;;  %v340_v25 = vpop.f32.mrf.mxu1 }
 0x119   : > { %383 = vst [vmem:[%s242_s30] sm:$0xff] %v320_v24  ;;  %v415_v26 = vadd.f32 %v340_v25, %v320_v24  ;;  %v424_v27 = vmul.f32 %v320_v24, %v320_v24  ;;  %v425_v28 = vmul.f32 %v340_v25, %v340_v25 }
 0x11a   : > { %384 = vst [vmem:[%s242_s30 + $0x8] sm:$0xff] %v340_v25 }
 0x11b   : > { %v428_v32 = vadd.f32 %v425_v28, %v424_v27 }
 0x11d   : > { %v360_v29 = vpop.f32.mrf.mxu2  ;;  %v380_v30 = vpop.f32.mrf.mxu3 }
 0x11e   : > { %385 = vst [vmem:[%s242_s30 + $0x10] sm:$0xff] %v360_v29  ;;  %v416_v31 = vadd.f32 %v415_v26, %v360_v29  ;;  %v426_v33 = vmul.f32 %v360_v29, %v360_v29  ;;  %v427_v35 = vmul.f32 %v380_v30, %v380_v30 }
 0x11f   : > { %386 = vst [vmem:[%s242_s30 + $0x18] sm:$0xff] %v380_v30 }
 0x120   : > { %v417_v34 = vadd.f32 %v416_v31, %v380_v30  ;;  %v429_v36 = vadd.f32 %v428_v32, %v426_v33 }
 0x122   : > { %418 = vadd.xlane.f32.xlu1 %v417_v34  ;;  %v430_v37 = vadd.f32 %v429_v36, %v427_v35 }
 0x12a   : > { %431 = vadd.xlane.f32.xlu1 %v430_v37 }
 0x195   : > { %v419_v39 = vpop.xlane.xlu1 %418 }
 0x196   : > { %v420_v40 = vadd.f32 %v419_v39, %v414_v38 }
 0x198   : > { %422 = vst.msk [vmem:[#allocation2] sm:$0xff] %vm421_vm3, %v420_v40 }
 0x19d   : > { %v432_v42 = vpop.xlane.xlu1 %431 }
 0x19f   : > { %v423_v41 = vld [vmem:[#allocation2] sm:$0xff] }
 0x1a0   : > { %v433_v43 = vadd.f32 %v432_v42, %v423_v41 }
 0x1a2   : > { %435 = vst.msk [vmem:[#allocation2] sm:$0xff] %vm434_vm4, %v433_v43 }
 0x1a9   : > { %v439_v44 = vld [vmem:[#allocation2] sm:$0xff] }
 0x1aa   : > { %441 = vst.msk [vmem:[%s247_s8] sm:$0xff] %vm252_vm2, %v439_v44 }
 0x1ab PF: > { %s15_s17 = sadd.s32 1, %s634_s17   ;;  %s719_s15 = smov %s630_s16 }
 0x1ac   : > { %p12_p5 = scmp.ge.s32.totalorder %s15_s17, 6   ;;  %s720_s16 = smov %s722_s18 }
 0x1ae   :  { %14 = sbr.rel (!%p12_p5) target bundleno = 2 (0x2), region = 83 }

// kernel: group_up_conv.2
= control target key start
LH: loop header
LB: loop body
LE: loop exit
PB: predicated region body
PF: predicated region fallthrough
CT: control target
= control target key end

     0   :  { %s799_s18 = smov [#allocation5]   ;;  %s922_s0 = inlined_call_operand.vmem [shape: s32[4,4], index: 0, kind: input, shape index: {}]   ;;  %s923_s1 = inlined_call_operand.vmem [shape: f32[9,4,512], index: 1, kind: input, shape index: {}]   ;;  %s924_s2 = inlined_call_operand.vmem [shape: f32[4,4,4,4], index: 2, kind: input, shape index: {}]   ;;  %s925_s3 = inlined_call_operand.vmem [shape: f32[4,4,512], index: 3, kind: output, shape index: {0}]   ;;  %s926_s4 = inlined_call_operand.vmem [shape: f32[4,4,2], index: 4, kind: output, shape index: {1}]  }
   0x1   :  { %s11_s17 = sshll.u32 %s922_s0, 4  ;;  %s12_s17 = int_to_ptr.vmem [resolvable:$true] %s11_s17 }
   0x2   :  { %14 = dma.vmem_to_smem %s12_s17, 64, %s799_s18, [#allocation4] }
   0x3   :  { %777 = dma.done.wait [#allocation4], 64 }
   0x4   :  { %778 = vsyncadd [#allocation4], 4294967232 }
   0x5   :  { %17 = sfence }
   0x6   :  { %s830_s19 = smov 0   ;;  %s832_s20 = smov 0  }
   0x7   :  { %s834_s21 = smov 0   ;;  %s836_s22 = smov 0  }
   0x8   :  { %s838_s23 = smov 0  }
   0x9 LB: > { %s35_s0 = sadd.s32 1, %s789_s21  ;;  %s42_s24 = sadd.s32 1, %s793_s22  ;;  %s797_s23 = sphi %s838_s23, %s23_s23   ;;  %s793_s22 = sphi %s836_s22, %s930_s22   ;;  %s789_s21 = sphi %s834_s21, %s929_s21   ;;  %s785_s20 = sphi %s832_s20, %s928_s20   ;;  %s781_s19 = sphi %s830_s19, %s927_s19  }
   0xa   : > { %p36_p0 = scmp.ge.s32.totalorder %s35_s0, 4  ;;  %p675_p1 = scmp.ge.s32.totalorder %s797_s23, 1 }
   0xb   : > { %p224_p2 = scmp.lt.s32.totalorder %s797_s23, 17 }
   0xc   : > { %s932_s0 = smov (%p36_p0, %s35_s0), 0  ;;  %s934_s24 = smov (!%p36_p0, %s42_s24), %s793_s22 }
   0xd   : > { %p225_p3 = pnand %p675_p1, %p224_p2  ;;  %p44_p4 = scmp.ge.s32.totalorder %s934_s24, 4 }
   0xe   : > { %s276_s25 = sshra.s32 (!%p225_p3), %s781_s19, 7  ;;  %s281_s26 = sand.u32 (!%p225_p3), 127, %s781_s19 }
   0xf   : > { %s936_s24 = smov (%p44_p4, %s934_s24), 0  ;;  %228 = sbr.rel (%p225_p3) target bundleno = 347 (0x15b), region = 28 }
  0x10   : > { %s278_s27 = sadd.s32 (!%p225_p3), %s785_s20, %s276_s25  ;;  %p302_p5 = scmp.lt.s32.totalorder (!%p225_p3), %s785_s20, 3 }
  0x11   : > { %s676_s28 = sshll.u32 (!%p225_p3), %s278_s27, 7  ;;  %p304_p6 = scmp.lt.s32.totalorder (!%p225_p3), %s781_s19, 3 }
  0x12   : > { %s282_s29 = sadd.s32 (!%p225_p3), %s676_s28, %s281_s26  ;;  %p325_p7 = scmp.eq.s32.totalorder (!%p225_p3), %s781_s19, 0 }
  0x13   : > { %s283_s30 = sld [smem:[#allocation5 + %s282_s29]] (!%p225_p3) }
  0x14   : > { %s938_s20 = smov (!%p302_p5, %s785_s20), 3  ;;  %vm330_vm0 = vcmask (%p325_p7), 11264   ;;  %v800_v0 = vmov (%p325_p7), 0.0  }
  0x15   : > { %s305_s5 = scalar_select %p304_p6, %s781_s19, 3  ;;  %331 = vst.msk [vmem:[#allocation3] sm:$0xf] (%p325_p7), %vm330_vm0, %v800_v0 }
  0x16   : > { %s679_s6 = sshll.u32 %s938_s20, 2  ;;  %s699_s7 = sshll.u32 %s938_s20, 4 }
  0x17   : > { %s307_s8 = sadd.s32 %s679_s6, %s305_s5  ;;  %s870_s11 = scalar_lea.vmem %s925_s3, %s699_s7 }
  0x18   : > { %s680_s12 = sshll.u32 %s307_s8, 2  ;;  %s875_s15 = scalar_lea.vmem %s926_s4, %s679_s6 }
  0x19   : > { %p285_p8 = scmp.lt.s32.totalorder %s283_s30, 8  ;;  %s309_s18 = scalar_lea.vmem %s924_s2, %s680_s12 }
  0x1a   : > { %329 = sbr.rel (!%p325_p7) target bundleno = 31 (0x1f), region = 32 }
  0x1b   : > { %s940_s30 = smov (!%p285_p8, %s283_s30), 8 }
  0x1c   : > { %s698_s25 = sshll.u32 %s940_s30, 4 }
  0x1d   : > { %s292_s27 = scalar_lea.vmem %s923_s1, %s698_s25 }
  0x1f PF: > { %p685_p9 = scmp.ne.s32.totalorder %s781_s19, 0 }
  0x21   : > { %334 = sbr.rel (%p685_p9) target bundleno = 41 (0x29), region = 36 }
  0x26   : > { %v801_v1 = vmov 0.0  }
  0x27   : > { %335 = vst [vmem:[#allocation2] sm:$0xff] %v801_v1 }
  0x28   : > { %336 = vst [vmem:[#allocation2 + $0x8] sm:$0xff] %v801_v1 }
  0x29 PF: > { %v341_v2 = vld [vmem:[%s292_s27 + $0x8] sm:$0xff]  ;;  %v340_v3 = vld [vmem:[%s292_s27] sm:$0xff]  ;;  %vm355_vm1 = vcmask 1043456   ;;  %vm351_vm2 = vcmask 31744   ;;  %p458_p10 = scmp.eq.s32.totalorder %s781_s19, 3  ;;  %p694_p11 = scmp.ne.s32.totalorder %s781_s19, 3 }
  0x2a   : > { %346 = vst [vmem:[#allocation1 + $0x10] ss:$2 sm:$0xff] %v341_v2  ;;  %v339_v4 = vld [vmem:[%s309_s18] sm:$0xf] }
  0x2b   : > { %344 = vst [vmem:[#allocation1] ss:$2 sm:$0xff] %v340_v3 }
  0x2e   : > { %v337_v12 = vld [vmem:[#allocation2] sm:$0xff] }
  0x2f   : > { %v338_v18 = vld [vmem:[#allocation2 + $0x8] sm:$0xff] }
  0x31   : > { %v350_v5 = vld.sshfl [vmem:[#allocation1 + $0x18] sm:$0xff pattern:$0x75316420]  ;;  %v349_v6 = vld.sshfl [vmem:[#allocation1 + $0x10] sm:$0xff pattern:$0x75316420] }
  0x32   : > { %692 = vmatpush.msk.msra.mxu3 %vm355_vm1, %v350_v5  ;;  %690 = vmatpush.msk.msra.mxu2 %vm355_vm1, %v349_v6  ;;  %v348_v7 = vld.sshfl [vmem:[#allocation1 + $0x8] sm:$0xff pattern:$0x75316420]  ;;  %v347_v8 = vld.sshfl [vmem:[#allocation1] sm:$0xff pattern:$0x75316420] }
  0x33   : > { %693 = vmatmul.msk.f32.vlgmr.msra.gmra.mxu3 %vm351_vm2, %v339_v4  ;;  %691 = vmatmul.msk.f32.vlgmr.msra.gmra.mxu2 %vm351_vm2, %v339_v4 }
  0x34   : > { %688 = vmatpush.msk.msra.mxu1 %vm355_vm1, %v348_v7  ;;  %686 = vmatpush.msk.msra.mxu0 %vm355_vm1, %v347_v8 }
  0x35   : > { %689 = vmatmul.msk.f32.vlgmr.msra.gmra.mxu1 %vm351_vm2, %v339_v4  ;;  %687 = vmatmul.msk.f32.vlgmr.msra.gmra.mxu0 %vm351_vm2, %v339_v4 }
  0xb2   : > { %v401_v9 = vpop.f32.mrf.mxu1  ;;  %v381_v10 = vpop.f32.mrf.mxu0 }
  0xb3   : > { %v448_v11 = vrot.slane %v401_v9, 4 }
  0xb5   : > { %v450_v13 = vsel %vm355_vm1, %v381_v10, %v448_v11 }
  0xb6   : > { %v441_v14 = vpop.f32.mrf.mxu3  ;;  %v454_v15 = vadd.f32 %v450_v13, %v337_v12  ;;  %v421_v16 = vpop.f32.mrf.mxu2 }
  0xb7   : > { %v449_v17 = vrot.slane %v441_v14, 4 }
  0xb8   : > { %456 = vst [vmem:[#allocation2] sm:$0xff] %v454_v15  ;;  %461 = sbr.rel (%p694_p11) target bundleno = 339 (0x153), region = 40 }
  0xb9   : > { %v451_v19 = vsel %vm355_vm1, %v421_v16, %v449_v17 }
  0xba   : > { %v455_v20 = vadd.f32 %v451_v19, %v338_v18 }
  0xbc   : > { %457 = vst [vmem:[#allocation2 + $0x8] sm:$0xff] %v455_v20 }
  0xbd   : > { %v466_v47 = vld [vmem:[#allocation3] sm:$0xf]  ;;  %vm490_vm3 = vcmask 3072   ;;  %vm518_vm4 = vcmask 11272  }
  0xbf   : > { %v462_v21 = vld [vmem:[#allocation2] sm:$0xff] }
  0xc0   : > { %469 = vst [vmem:[#allocation1] ss:$2 sm:$0xff] %v462_v21  ;;  %v493_v23 = vmul.f32 %v462_v21, %v462_v21 }
  0xc1   : > { %464 = vst [vmem:[%s870_s11] sm:$0xff] %v462_v21 }
  0xc3   : > { %v463_v22 = vld [vmem:[#allocation2 + $0x8] sm:$0xff] }
  0xc4   : > { %465 = vst [vmem:[%s870_s11 + $0x8] sm:$0xff] %v463_v22  ;;  %v494_v24 = vmul.f32 %v463_v22, %v463_v22 }
  0xc5   : > { %471 = vst [vmem:[#allocation1 + $0x10] ss:$2 sm:$0xff] %v463_v22 }
  0xc7   : > { %v472_v25 = vld.sshfl [vmem:[#allocation1] sm:$0xff pattern:$0x75316420]  ;;  %v473_v26 = vld.sshfl [vmem:[#allocation1 + $0x8] sm:$0xff pattern:$0x75316420] }
  0xc8   : > { %v480_v29 = vsel %vm355_vm1, %v472_v25, 0.0  ;;  %v481_v30 = vsel %vm355_vm1, %v473_v26, 0.0  ;;  %497 = vst [vmem:[#allocation1] ss:$2 sm:$0xff] %v493_v23 }
  0xc9   : > { %v482_v32 = vadd.f32 %v481_v30, %v480_v29 }
  0xcc   : > { %v474_v27 = vld.sshfl [vmem:[#allocation1 + $0x10] sm:$0xff pattern:$0x75316420]  ;;  %v475_v28 = vld.sshfl [vmem:[#allocation1 + $0x18] sm:$0xff pattern:$0x75316420] }
  0xcd   : > { %v483_v31 = vsel %vm355_vm1, %v474_v27, 0.0  ;;  %499 = vst [vmem:[#allocation1 + $0x10] ss:$2 sm:$0xff] %v494_v24  ;;  %v485_v33 = vsel %vm355_vm1, %v475_v28, 0.0 }
  0xce   : > { %v484_v34 = vadd.f32 %v483_v31, %v482_v32 }
  0xcf   : > { %v500_v36 = vld.sshfl [vmem:[#allocation1] sm:$0xff pattern:$0x75316420]  ;;  %v501_v37 = vld.sshfl [vmem:[#allocation1 + $0x8] sm:$0xff pattern:$0x75316420] }
  0xd0   : > { %v486_v35 = vadd.f32 %v485_v33, %v484_v34  ;;  %v508_v40 = vsel %vm355_vm1, %v500_v36, 0.0  ;;  %v509_v41 = vsel %vm355_vm1, %v501_v37, 0.0 }
  0xd1   : > { %v510_v43 = vadd.f32 %v509_v41, %v508_v40 }
  0xd2   : > { %487 = vadd.xlane.f32.xlu0 %v486_v35 }
  0xd4   : > { %v502_v38 = vld.sshfl [vmem:[#allocation1 + $0x10] sm:$0xff pattern:$0x75316420]  ;;  %v503_v39 = vld.sshfl [vmem:[#allocation1 + $0x18] sm:$0xff pattern:$0x75316420] }
  0xd5   : > { %v511_v42 = vsel %vm355_vm1, %v502_v38, 0.0  ;;  %v513_v44 = vsel %vm355_vm1, %v503_v39, 0.0 }
  0xd6   : > { %v512_v45 = vadd.f32 %v511_v42, %v510_v43 }
  0xd8   : > { %v514_v46 = vadd.f32 %v513_v44, %v512_v45 }
  0xda   : > { %515 = vadd.xlane.f32.xlu0 %v514_v46 }
 0x145   : > { %v488_v48 = vpop.xlane.xlu0 %487 }
 0x146   : > { %v489_v49 = vadd.f32 %v488_v48, %v466_v47 }
 0x148   : > { %491 = vst.msk [vmem:[#allocation3] sm:$0xf] %vm490_vm3, %v489_v49 }
 0x14d   : > { %v516_v50 = vpop.xlane.xlu0 %515 }
 0x14f   : > { %v492_v51 = vld [vmem:[#allocation3] sm:$0xf] }
 0x150   : > { %v517_v52 = vadd.f32 %v516_v50, %v492_v51 }
 0x152   : > { %519 = vst.msk [vmem:[#allocation3] sm:$0xf] %vm518_vm4, %v517_v52 }
 0x153 PF: > { %523 = sbr.rel (!%p458_p10) target bundleno = 347 (0x15b), region = 44  ;;  %vm525_vm5 = vcmask (%p458_p10), 11264  }
 0x159   : > { %v524_v53 = vld [vmem:[#allocation3] sm:$0xf] }
 0x15a   : > { %526 = vst.msk [vmem:[%s875_s15] sm:$0xf] %vm525_vm5, %v524_v53 }
 0x15b PF: > { %s23_s23 = sadd.s32 1, %s797_s23   ;;  %s927_s19 = smov %s789_s21 }
 0x15c   : > { %p20_p12 = scmp.ge.s32.totalorder %s23_s23, 18   ;;  %s928_s20 = smov %s793_s22 }
 0x15d   : > { %s929_s21 = smov %s932_s0  ;;  %s930_s22 = smov %s936_s24 }
 0x15e   :  { %22 = sbr.rel (!%p20_p12) target bundleno = 9 (0x9), region = 92 }

</bundles_post_ra>
